<compile_context>
chip_gen: v6e
topology: v6e:2x2x1
jax: 0.10.0
libtpu: 0.0.40
codegen_flags: <defaults>
</compile_context>

<pallas_src>
import functools

import jax
import jax.numpy as jnp
from jax.experimental import pallas as pl
from jax.experimental.pallas import tpu as pltpu

GAMMA = 2.0
ALPHA = 1.0

# ~2 MiB per (f32) block buffer; with 2 inputs + 1 output double-buffered this
# is 12 MiB of scoped VMEM, safely under v5e's 16 MiB default (and v6e/v7x's 32 MiB).
_TARGET_BLOCK_BYTES = 2 * 1024 * 1024
_LANE_CANDIDATES = (4096, 2048, 1024, 512, 256, 128)  # lane-dense last dim
_FALLBACK_LANES = 1024
_ROW_TILE_QUANTUM = 32  # covers f32 (8,128), bf16 (16,128), int8 (32,128) packing


def _focal_loss_kernel(x_ref, t_ref, o_ref, *, gamma, alpha):
    x = x_ref[...].astype(jnp.float32)
    t = t_ref[...].astype(jnp.float32)

    # Shared transcendental: e = exp(-|x|) feeds both the stable BCE log term
    # and the sigmoid, so per element we pay one exp + one log1p + one recip
    # instead of the ~6 EUP ops of the naive formulation (matters on v7x).
    e = jnp.exp(-jnp.abs(x))

    # Numerically stable BCE-with-logits (reduction='none'):
    #   max(x, 0) - x*t + log(1 + exp(-|x|))
    bce = jnp.maximum(x, 0.0) - x * t + jnp.log1p(e)

    # sigmoid(x) = 1/(1+e) for x >= 0, e/(1+e) for x < 0.
    inv = pl.reciprocal(1.0 + e, approx=False)
    p = jnp.where(x >= 0.0, inv, e * inv)

    d = jnp.abs(t - p)
    if gamma == 2.0:        # static specialization: avoids exp(gamma*log(d))
        mod = d * d
    elif gamma == 1.0:
        mod = d
    else:
        mod = jnp.power(d, gamma)

    loss = bce * mod
    if alpha != 1.0:        # static: skip the multiply at the default alpha
        loss = loss * alpha
    o_ref[...] = loss.astype(o_ref.dtype)


def _pick_lanes(n):
    """Largest lane width (multiple of 128) dividing n; else pad fallback."""
    for lanes in _LANE_CANDIDATES:
        if n % lanes == 0:
            return lanes, 0
    lanes = _FALLBACK_LANES
    return lanes, (-n) % lanes


def focal_loss(x, target, *, gamma=GAMMA, alpha=ALPHA):
    """Elementwise focal loss (reduction='none'); output has x's shape/dtype."""
    assert x.shape == target.shape, "input/target shapes must match"
    orig_shape = x.shape
    orig_dtype = x.dtype
    n = x.size

    lanes, pad = _pick_lanes(n)
    xf = jnp.ravel(x)        # contiguous reshape: free
    tf = jnp.ravel(target)
    if pad:
        # TODO(synk): only truly ragged sizes (not a multiple of 128) take this
        # padded-copy path; 128-aligned sizes go through reshape-only plumbing.
        xf = jnp.pad(xf, (0, pad))
        tf = jnp.pad(tf, (0, pad))

    rows = (n + pad) // lanes
    x2 = xf.reshape(rows, lanes)
    t2 = tf.reshape(rows, lanes)

    # Row tile sized for ~_TARGET_BLOCK_BYTES of f32 per buffer.
    row_tile = max(
        _ROW_TILE_QUANTUM,
        (_TARGET_BLOCK_BYTES // (lanes * 4)) // _ROW_TILE_QUANTUM * _ROW_TILE_QUANTUM,
    )
    if rows <= row_tile:
        row_tile = rows                       # full-dim block (exempt from (8,128) rule)
        grid = (1,)
    else:
        grid = (pl.cdiv(rows, row_tile),)     # partial last block handled by Pallas

    block = (row_tile, lanes)
    kernel = functools.partial(_focal_loss_kernel, gamma=gamma, alpha=alpha)

    out2 = pl.pallas_call(
        kernel,
        out_shape=jax.ShapeDtypeStruct((rows, lanes), orig_dtype),
        grid_spec=pltpu.PrefetchScalarGridSpec(
            num_scalar_prefetch=0,
            grid=grid,
            in_specs=[
                pl.BlockSpec(block, lambda i: (i, 0)),
                pl.BlockSpec(block, lambda i: (i, 0)),
            ],
            out_specs=pl.BlockSpec(block, lambda i: (i, 0)),
        ),
        compiler_params=pltpu.CompilerParams(
            dimension_semantics=("parallel",),  # lets v7x shard steps across both TCs
        ),
    )(x2, t2)

    out = jnp.ravel(out2)
    if pad:
        out = out[:n]
    return out.reshape(orig_shape)


def _reference(x, target, gamma=GAMMA, alpha=ALPHA):
    x = x.astype(jnp.float32)
    t = target.astype(jnp.float32)
    bce = jnp.maximum(x, 0.0) - x * t + jnp.log1p(jnp.exp(-jnp.abs(x)))
    return bce * alpha * jnp.power(jnp.abs(t - jax.nn.sigmoid(x)), gamma)


if __name__ == "__main__":
    key = jax.random.PRNGKey(0)

    shapes = [
        (2, 4, 16, 16),   # NCHW, n = 2048 -> reshape-only, lanes = 2048
        (2, 3, 16, 16),   # n = 1536 -> lanes = 512 divisor path
        (5, 7, 9),        # ragged n = 315 -> padded fallback path
    ]
    for idx, shape in enumerate(shapes):
        k1, k2 = jax.random.split(jax.random.fold_in(key, idx))
        x = jax.random.normal(k1, shape, dtype=jnp.float32)
        target = (jax.random.uniform(k2, shape) > 0.5).astype(jnp.float32)

        out = jax.block_until_ready(focal_loss(x, target))
        ref = _reference(x, target)
        assert out.shape == x.shape and out.dtype == x.dtype
        assert jnp.allclose(out, ref, atol=1e-5, rtol=1e-5), f"mismatch at {shape}"

    print("KERNEL_OK")
</pallas_src>

<mosaic_0001>
module attributes {stable_mosaic.version = 11 : i64} {
  func.func @_focal_loss_kernel(%arg0: i32, %arg1: memref<1x2048xf32, #tpu.memory_space<vmem>>, %arg2: memref<1x2048xf32, #tpu.memory_space<vmem>>, %arg3: memref<1x2048xf32, #tpu.memory_space<vmem>>) attributes {dimension_semantics = [#tpu.dimension_semantics<parallel>], iteration_bounds = array<i64: 1>, scalar_prefetch = 0 : i64, scratch_operands = 0 : i64, tpu.core_type = #tpu.core_type<tc>, window_params = [{transform_indices = @transform_0, window_bounds = array<i64: 1, 2048>}, {transform_indices = @transform_1, window_bounds = array<i64: 1, 2048>}, {transform_indices = @transform_2, window_bounds = array<i64: 1, 2048>}]} {
    %c0 = arith.constant 0 : index
    %c0_0 = arith.constant 0 : index
    %0 = vector.load %arg1[%c0, %c0_0] : memref<1x2048xf32, #tpu.memory_space<vmem>>, vector<1x2048xf32>
    %c0_1 = arith.constant 0 : index
    %c0_2 = arith.constant 0 : index
    %1 = vector.load %arg2[%c0_1, %c0_2] : memref<1x2048xf32, #tpu.memory_space<vmem>>, vector<1x2048xf32>
    %2 = math.absf %0 : vector<1x2048xf32>
    %cst = arith.constant 0.000000e+00 : f32
    %3 = vector.broadcast %cst : f32 to vector<1x2048xf32>
    %4 = arith.subf %3, %2 : vector<1x2048xf32>
    %5 = math.exp %4 : vector<1x2048xf32>
    %cst_3 = arith.constant 0.000000e+00 : f32
    %6 = vector.broadcast %cst_3 : f32 to vector<1x2048xf32>
    %7 = arith.maximumf %0, %6 : vector<1x2048xf32>
    %8 = arith.mulf %0, %1 : vector<1x2048xf32>
    %9 = arith.subf %7, %8 : vector<1x2048xf32>
    %10 = math.log1p %5 : vector<1x2048xf32>
    %11 = arith.addf %9, %10 : vector<1x2048xf32>
    %cst_4 = arith.constant 1.000000e+00 : f32
    %12 = vector.broadcast %cst_4 : f32 to vector<1x2048xf32>
    %13 = arith.addf %12, %5 : vector<1x2048xf32>
    %14 = tpu.reciprocal %13 : vector<1x2048xf32> -> vector<1x2048xf32>
    %cst_5 = arith.constant 0.000000e+00 : f32
    %15 = vector.broadcast %cst_5 : f32 to vector<1x2048xf32>
    %16 = arith.cmpf oge, %0, %15 : vector<1x2048xf32>
    %17 = arith.mulf %5, %14 : vector<1x2048xf32>
    %18 = arith.select %16, %14, %17 : vector<1x2048xi1>, vector<1x2048xf32>
    %19 = arith.subf %1, %18 : vector<1x2048xf32>
    %20 = math.absf %19 : vector<1x2048xf32>
    %21 = arith.mulf %20, %20 : vector<1x2048xf32>
    %22 = arith.mulf %11, %21 : vector<1x2048xf32>
    %c0_6 = arith.constant 0 : index
    %c0_7 = arith.constant 0 : index
    %23 = vector.load %arg3[%c0_6, %c0_7] : memref<1x2048xf32, #tpu.memory_space<vmem>>, vector<1x2048xf32>
    tpu.vector_store %arg3[%c0_6, %c0_7], %22 {strides = array<i32>} : memref<1x2048xf32, #tpu.memory_space<vmem>>, vector<1x2048xf32>,
    return
  }
  func.func @transform_0(%arg0: i32) -> (i32, i32) {
    %c0_i32 = arith.constant 0 : i32
    %c0_i32_0 = arith.constant 0 : i32
    return %arg0, %c0_i32 : i32, i32
  }
  func.func @transform_1(%arg0: i32) -> (i32, i32) {
    %c0_i32 = arith.constant 0 : i32
    %c0_i32_0 = arith.constant 0 : i32
    return %arg0, %c0_i32 : i32, i32
  }
  func.func @transform_2(%arg0: i32) -> (i32, i32) {
    %c0_i32 = arith.constant 0 : i32
    %c0_i32_0 = arith.constant 0 : i32
    return %arg0, %c0_i32 : i32, i32
  }
}

</mosaic_0001>

<bundles_post_ra>
// kernel: tpu_custom_call.1
= control target key start
LH: loop header
LB: loop body
LE: loop exit
PB: predicated region body
PF: predicated region fallthrough
CT: control target
= control target key end

     0   :  { %7 = vsyncpa [#allocation3], 0  ;;  %s224_s0 = inlined_call_operand.hbm [shape: f32[1,2048], index: 0, kind: input, shape index: {}]   ;;  %s225_s1 = inlined_call_operand.hbm [shape: f32[1,2048], index: 1, kind: input, shape index: {}]   ;;  %s226_s2 = inlined_call_operand.hbm [shape: f32[1,2048], index: 2, kind: output, shape index: {}]  }
   0x1   :  { %8 = vsyncpa [#allocation6], 0 }
   0x2   :  { %9 = vsyncpa [#allocation4], 0  ;;  %s191_s9 = smov [#allocation2]   ;;  %s192_s11 = smov [#allocation5]  }
   0x3   :  { %s16_s10 = sshll.u32 %s191_s9, 4  ;;  %s26_s12 = sshll.u32 %s192_s11, 4  ;;  %s17_s10 = int_to_ptr.vmem [resolvable:$true] %s16_s10  ;;  %s27_s12 = int_to_ptr.vmem [resolvable:$true] %s26_s12 }
   0x4   :  { %s133_s13 = scalar_lea.vmem %s17_s10, 256  ;;  %p138_p1 = scmp.lt.s32.totalorder %s17_s10, %s17_s10 }
   0x5   :  { %p134_p0 = scmp.ne.s32.totalorder %s17_s10, %s133_s13  ;;  %p139_p2 = scmp.lt.s32.totalorder %s133_s13, %s133_s13 }
   0x7   :  { %p140_p3 = por %p139_p2, %p138_p1 }
   0x9   :  { %p141_p4 = pnand %p140_p3, %p134_p0 }
   0xb   :  { %144 = shalt.err (!%p141_p4)
}
   0xc   :  { %19 = dma.hbm_to_vmem [thread:$0]  %s224_s0, 256, %s17_s10, [#allocation3]  }
   0xd   :  { %s153_s16 = scalar_lea.vmem %s27_s12, 256  ;;  %p158_p6 = scmp.lt.s32.totalorder %s27_s12, %s27_s12 }
   0xe   :  { %p154_p5 = scmp.ne.s32.totalorder %s27_s12, %s153_s16  ;;  %p159_p7 = scmp.lt.s32.totalorder %s153_s16, %s153_s16 }
  0x10   :  { %p160_p8 = por %p159_p7, %p158_p6 }
  0x12   :  { %p161_p9 = pnand %p160_p8, %p154_p5 }
  0x14   :  { %164 = shalt.err (!%p161_p9)
}
  0x15   :  { %29 = dma.hbm_to_vmem [thread:$0]  %s225_s1, 256, %s27_s12, [#allocation6]  }
  0x16   :  { %185 = dma.done.wait [#allocation3], 256  }
  0x17   :  { %186 = vsyncadd [#allocation3], 4294967040 }
  0x18   :  { %187 = dma.done.wait [#allocation6], 256  }
  0x19   :  { %188 = vsyncadd [#allocation6], 4294967040  ;;  %v36_v0 = vld [vmem:[#allocation2] sm:$0xff]  ;;  %v37_v1 = vld [vmem:[#allocation2 + $0x8] sm:$0xff]  ;;  %s193_s0 = smov [#allocation7]  }
  0x1a   :  { %v40_v2 = vand.u32 2147483647, %v36_v0  ;;  %v41_v3 = vand.u32 2147483647, %v37_v1  ;;  %v38_v14 = vld [vmem:[#allocation5] sm:$0xff]  ;;  %v39_v17 = vld [vmem:[#allocation5 + $0x8] sm:$0xff] }
  0x1b   :  { %v48_v19 = vmax.f32 %v36_v0, 0.0  ;;  %v50_v20 = vmul.f32 %v38_v14, %v36_v0  ;;  %vm78_vm0 = vcmp.ge.f32.partialorder %v36_v0, 0.0  ;;  %v49_v27 = vmax.f32 %v37_v1, 0.0  ;;  %s100_s1 = sshll.u32 %s193_s0, 4  ;;  %s101_s1 = int_to_ptr.vmem [resolvable:$true] %s100_s1 }
  0x1c   :  { %v42_v4 = vsub.f32 0.0, %v40_v2  ;;  %v43_v5 = vsub.f32 0.0, %v41_v3  ;;  %v51_v28 = vmul.f32 %v39_v17, %v37_v1  ;;  %vm79_vm3 = vcmp.ge.f32.partialorder %v37_v1, 0.0  ;;  %s165_s19 = scalar_lea.vmem %s101_s1, 256  ;;  %p170_p11 = scmp.lt.s32.totalorder %s101_s1, %s101_s1 }
  0x1d   :  { %v52_v33 = vsub.f32 %v48_v19, %v50_v20  ;;  %p166_p10 = scmp.ne.s32.totalorder %s101_s1, %s165_s19  ;;  %p171_p12 = scmp.lt.s32.totalorder %s165_s19, %s165_s19 }
  0x1e   :  { %v44_v6 = vmul.f32 1.442695, %v42_v4  ;;  %v46_v7 = vmul.f32 1.442695, %v43_v5  ;;  %v53_v39 = vsub.f32 %v49_v27, %v51_v28 }
  0x1f   :  { %p172_p13 = por %p171_p12, %p170_p11 }
  0x20   :  { %113 = vpow2.f32 %v44_v6 }
  0x21   :  { %115 = vpow2.f32 %v46_v7  ;;  %p173_p0 = pnand %p172_p13, %p166_p10 }
  0x2d   :  { %v114_v8 = vpop.eup %113 }
  0x2e   :  { %v116_v9 = vpop.eup %115  ;;  %v54_v10 = vadd.f32 1.0, %v114_v8  ;;  %v57_v12 = vmul.f32 -0.5, %v114_v8  ;;  %v60_v16 = vand.u32 2147483647, %v114_v8 }
  0x2f   :  { %v63_v11 = vadd.f32 1.0, %v116_v9  ;;  %v66_v13 = vmul.f32 -0.5, %v116_v9  ;;  %v69_v21 = vand.u32 2147483647, %v116_v9 }
  0x30   :  { %117 = vlog2.f32 %v54_v10  ;;  %v58_v15 = vadd.f32 1.0, %v57_v12  ;;  %vm215_vm1 = vcmp.lt.f32.partialorder %v60_v16, 0.0004427343 }
  0x31   :  { %119 = vrcp.f32 %v54_v10  ;;  %v67_v18 = vadd.f32 1.0, %v66_v13  ;;  %vm70_vm2 = vcmp.lt.f32.partialorder %v69_v21, 0.0004427343 }
  0x32   :  { %121 = vlog2.f32 %v63_v11  ;;  %v59_v23 = vmul.f32 %v114_v8, %v58_v15 }
  0x33   :  { %123 = vrcp.f32 %v63_v11  ;;  %v68_v31 = vmul.f32 %v116_v9, %v67_v18 }
  0x3d   :  { %v118_v22 = vpop.eup %117 }
  0x3e   :  { %v120_v24 = vpop.eup %119  ;;  %v56_v25 = vmul.f32 0.6931472, %v118_v22 }
  0x3f   :  { %v122_v29 = vpop.eup %121  ;;  %v80_v30 = vmul.f32 %v120_v24, %v114_v8 }
  0x40   :  { %v124_v32 = vpop.eup %123  ;;  %v65_v34 = vmul.f32 0.6931472, %v122_v29  ;;  %v62_v35 = vsel %vm215_vm1, %v59_v23, %v56_v25 }
  0x41   :  { %v82_v36 = vsel %vm78_vm0, %v120_v24, %v80_v30  ;;  %v81_v37 = vmul.f32 %v124_v32, %v116_v9  ;;  %v72_v42 = vadd.f32 %v62_v35, %v52_v33 }
  0x42   :  { %v84_v38 = vsub.f32 %v38_v14, %v82_v36  ;;  %v71_v40 = vsel %vm70_vm2, %v68_v31, %v65_v34 }
  0x43   :  { %v83_v41 = vsel %vm79_vm3, %v124_v32, %v81_v37  ;;  %v73_v46 = vadd.f32 %v71_v40, %v53_v39 }
  0x44   :  { %v86_v43 = vand.u32 2147483647, %v84_v38  ;;  %v85_v44 = vsub.f32 %v39_v17, %v83_v41 }
  0x46   :  { %v88_v45 = vmul.f32 %v86_v43, %v86_v43  ;;  %v87_v47 = vand.u32 2147483647, %v85_v44 }
  0x48   :  { %v90_v48 = vmul.f32 %v88_v45, %v72_v42  ;;  %v89_v49 = vmul.f32 %v87_v47, %v87_v47 }
  0x4a   :  { %92 = vst [vmem:[#allocation7] sm:$0xff] %v90_v48  ;;  %v91_v50 = vmul.f32 %v89_v49, %v73_v46 }
  0x4c   :  { %93 = vst [vmem:[#allocation7 + $0x8] sm:$0xff] %v91_v50 }
  0x4d   :  { %176 = shalt.err (!%p173_p0)
}
  0x4e   :  { %103 = dma.vmem_to_hbm [thread:$0]  %s101_s1, 256, %s226_s2, [#allocation4]  }
  0x4f   :  { %189 = dma.done.wait [#allocation4], 256  }
  0x50   :  { %190 = vsyncadd [#allocation4], 4294967040 }
  0x51   :  { %107 = vsyncpa [#allocation3], 1 }
  0x52   :  { %108 = vsyncpa [#allocation6], 1 }
  0x53   :  { %109 = vsyncpa [#allocation4], 1 }

</bundles_post_ra>
